<compile_context>
chip_gen: v6e
topology: v6e:2x2x1
jax: 0.10.0
libtpu: 0.0.40
codegen_flags: <defaults>
</compile_context>

<pallas_src>
import functools

import jax
import jax.numpy as jnp
from jax.experimental import pallas as pl
from jax.experimental.pallas import tpu as pltpu


def _round_up(x, m):
    return (x + m - 1) // m * m


def _wfl_kernel(logits_ref, labels_ref, cw_ref, loss_ref, acc_ref,
                loss_acc, corr_acc, *, gamma, n_valid, tile_n, c):
    i = pl.program_id(0)

    @pl.when(i == 0)
    def _init():
        loss_acc[...] = jnp.zeros_like(loss_acc)
        corr_acc[...] = jnp.zeros_like(corr_acc)

    x = logits_ref[...].astype(jnp.float32)        # (tile_n, c)
    lbl = labels_ref[...]                          # (tile_n, 1) int32
    cw = cw_ref[...].astype(jnp.float32)           # (1, c)

    # One-hot targets rebuilt in-kernel from integer labels.
    col = jax.lax.broadcasted_iota(jnp.int32, (tile_n, c), 1)
    t_mask = col == lbl                            # (tile_n, c) bool

    # Validity mask for rows padded up to a multiple of tile_n.
    row = jax.lax.broadcasted_iota(jnp.int32, (tile_n, 1), 0) + i * tile_n
    valid = (row < n_valid).astype(jnp.float32)    # (tile_n, 1)

    # Shared stable softplus(-x) = max(-x, 0) + log1p(exp(-|x|)).
    sp_negx = jnp.maximum(-x, 0.0) + jnp.log1p(jnp.exp(-jnp.abs(x)))
    tx = jnp.where(t_mask, x, 0.0)                 # targets * logits

    # F.binary_cross_entropy_with_logits(reduction='none') == softplus(-x) + x - t*x
    ce = sp_negx + x - tx
    # modulator = exp(-gamma * t * x - gamma * log1p(exp(-x)))
    modulator = jnp.exp(-gamma * (tx + sp_negx))

    per_sample = jnp.sum(modulator * ce, axis=1, keepdims=True)          # (tile_n, 1)
    alpha = jnp.sum(jnp.where(t_mask, cw, 0.0), axis=1, keepdims=True)   # class_weights[labels]
    loss_acc[...] += jnp.sum(per_sample * alpha * valid,
                             axis=(0, 1), keepdims=True)

    # preds = argmax(logits, dim=1) with first-max-index tie-breaking (torch semantics).
    mx = jnp.max(x, axis=1, keepdims=True)
    pred = jnp.min(jnp.where(x == mx, col, jnp.int32(c)), axis=1, keepdims=True)
    correct = (pred == lbl).astype(jnp.float32) * valid
    corr_acc[...] += jnp.sum(correct, axis=(0, 1), keepdims=True)

    @pl.when(i == pl.num_programs(0) - 1)
    def _finalize():
        inv_n = 1.0 / float(n_valid)
        loss_ref[...] = loss_acc[...] * inv_n
        acc_ref[...] = corr_acc[...] * inv_n


def weighted_focal_loss(logits, labels, class_weights, gamma, *, tile_n=1024):
    """Returns (avg_loss, acc), matching WeightedFocalLoss.forward(js_divergence=False)."""
    n, c = logits.shape
    labels_i = labels.astype(jnp.int32)

    # Batch tile: multiple of 8 sublanes, no larger than the (8-padded) batch.
    tile_n = max(8, min(int(tile_n), _round_up(n, 8)))
    tile_n = _round_up(tile_n, 8)
    n_pad = _round_up(n, tile_n)
    if n_pad != n:
        logits = jnp.pad(logits, ((0, n_pad - n), (0, 0)))
        labels_i = jnp.pad(labels_i, (0, n_pad - n), constant_values=-1)

    labels_col = labels_i.reshape(n_pad, 1)
    cw_row = class_weights.astype(jnp.float32).reshape(1, c)

    kernel = functools.partial(_wfl_kernel, gamma=float(gamma),
                               n_valid=n, tile_n=tile_n, c=c)

    loss, acc = pl.pallas_call(
        kernel,
        grid=(n_pad // tile_n,),
        in_specs=[
            pl.BlockSpec((tile_n, c), lambda i: (i, 0)),   # logits (native dtype)
            pl.BlockSpec((tile_n, 1), lambda i: (i, 0)),   # labels (int32)
            pl.BlockSpec((1, c), lambda i: (0, 0)),        # class weights (tiny)
        ],
        out_specs=[
            pl.BlockSpec((1, 1), lambda i: (0, 0)),
            pl.BlockSpec((1, 1), lambda i: (0, 0)),
        ],
        out_shape=(
            jax.ShapeDtypeStruct((1, 1), jnp.float32),
            jax.ShapeDtypeStruct((1, 1), jnp.float32),
        ),
        scratch_shapes=[
            pltpu.VMEM((1, 1), jnp.float32),   # running loss sum
            pltpu.VMEM((1, 1), jnp.float32),   # running correct count
        ],
        compiler_params=pltpu.CompilerParams(
            dimension_semantics=("arbitrary",)),
    )(logits, labels_col, cw_row)

    return loss[0, 0], acc[0, 0]


def _reference(logits, labels, class_weights, gamma):
    """Pure-JAX reference mirroring the PyTorch forward, for a sanity check."""
    n, c = logits.shape
    x = logits.astype(jnp.float32)
    t = jnp.eye(c, dtype=jnp.float32)[labels]
    alpha = class_weights.astype(jnp.float32)[labels]
    ce = jnp.maximum(x, 0.0) - x * t + jnp.log1p(jnp.exp(-jnp.abs(x)))
    mod = jnp.exp(-gamma * t * x - gamma * jnp.log1p(jnp.exp(-x)))
    loss = (mod * ce).sum(axis=1) * alpha
    preds = jnp.argmax(x, axis=1)
    acc = jnp.mean((preds == labels).astype(jnp.float32))
    return loss.mean(), acc


if __name__ == "__main__":
    num_classes = 4
    gamma = 2.0
    class_weights = jnp.array([1.0, 2.0, 0.5, 1.5], dtype=jnp.float32)

    key = jax.random.PRNGKey(0)

    # Case 1: small batch, single grid step.
    k1, k2, k3, k4 = jax.random.split(key, 4)
    logits1 = jax.random.normal(k1, (8, num_classes), dtype=jnp.float32)
    labels1 = jax.random.randint(k2, (8,), 0, num_classes, dtype=jnp.int32)
    loss1, acc1 = weighted_focal_loss(logits1, labels1, class_weights, gamma)
    jax.block_until_ready((loss1, acc1))
    ref_l1, ref_a1 = _reference(logits1, labels1, class_weights, gamma)
    assert jnp.allclose(loss1, ref_l1, rtol=1e-5, atol=1e-5), (loss1, ref_l1)
    assert jnp.allclose(acc1, ref_a1), (acc1, ref_a1)

    # Case 2: batch not a multiple of the tile -> exercises tiling + padding path.
    logits2 = jax.random.normal(k3, (200, num_classes), dtype=jnp.float32)
    labels2 = jax.random.randint(k4, (200,), 0, num_classes, dtype=jnp.int32)
    loss2, acc2 = weighted_focal_loss(logits2, labels2, class_weights, gamma,
                                      tile_n=64)
    jax.block_until_ready((loss2, acc2))
    ref_l2, ref_a2 = _reference(logits2, labels2, class_weights, gamma)
    assert jnp.allclose(loss2, ref_l2, rtol=1e-5, atol=1e-5), (loss2, ref_l2)
    assert jnp.allclose(acc2, ref_a2), (acc2, ref_a2)

    print("KERNEL_OK")
</pallas_src>

<mosaic_0001>
module attributes {stable_mosaic.version = 11 : i64} {
  func.func @_wfl_kernel(%arg0: i32, %arg1: memref<8x4xf32, #tpu.memory_space<vmem>>, %arg2: memref<8x1xi32, #tpu.memory_space<vmem>>, %arg3: memref<1x4xf32, #tpu.memory_space<vmem>>, %arg4: memref<1x1xf32, #tpu.memory_space<vmem>>, %arg5: memref<1x1xf32, #tpu.memory_space<vmem>>, %arg6: memref<1x1xf32, #tpu.memory_space<vmem>>, %arg7: memref<1x1xf32, #tpu.memory_space<vmem>>) attributes {dimension_semantics = [#tpu.dimension_semantics<arbitrary>], iteration_bounds = array<i64: 1>, scalar_prefetch = 0 : i64, scratch_operands = 2 : i64, tpu.core_type = #tpu.core_type<tc>, window_params = [{transform_indices = @transform_0, window_bounds = array<i64: 8, 4>}, {transform_indices = @transform_1, window_bounds = array<i64: 8, 1>}, {pipeline_mode = #tpu.pipeline_mode<synchronous>, transform_indices = @transform_2, window_bounds = array<i64: 1, 4>}, {pipeline_mode = #tpu.pipeline_mode<synchronous>, transform_indices = @transform_3, window_bounds = array<i64: 1, 1>}, {pipeline_mode = #tpu.pipeline_mode<synchronous>, transform_indices = @transform_4, window_bounds = array<i64: 1, 1>}]} {
    %c0_i32 = arith.constant 0 : i32
    %0 = arith.cmpi eq, %arg0, %c0_i32 : i32
    %1 = arith.extui %0 : i1 to i32
    %c0_i32_0 = arith.constant 0 : i32
    %2 = arith.cmpi ne, %1, %c0_i32_0 : i32
    scf.if %2 {
      %cst_28 = arith.constant 0.000000e+00 : f32
      %77 = vector.broadcast %cst_28 : f32 to vector<1x1xf32>
      %c0_29 = arith.constant 0 : index
      %c0_30 = arith.constant 0 : index
      %78 = vector.load %arg6[%c0_29, %c0_30] : memref<1x1xf32, #tpu.memory_space<vmem>>, vector<1x1xf32>
      tpu.vector_store %arg6[%c0_29, %c0_30], %77 {strides = array<i32>} : memref<1x1xf32, #tpu.memory_space<vmem>>, vector<1x1xf32>,
      %cst_31 = arith.constant 0.000000e+00 : f32
      %79 = vector.broadcast %cst_31 : f32 to vector<1x1xf32>
      %c0_32 = arith.constant 0 : index
      %c0_33 = arith.constant 0 : index
      %80 = vector.load %arg7[%c0_32, %c0_33] : memref<1x1xf32, #tpu.memory_space<vmem>>, vector<1x1xf32>
      tpu.vector_store %arg7[%c0_32, %c0_33], %79 {strides = array<i32>} : memref<1x1xf32, #tpu.memory_space<vmem>>, vector<1x1xf32>,
    } else {
    }
    %c0 = arith.constant 0 : index
    %c0_1 = arith.constant 0 : index
    %3 = vector.load %arg1[%c0, %c0_1] : memref<8x4xf32, #tpu.memory_space<vmem>>, vector<8x4xf32>
    %c0_2 = arith.constant 0 : index
    %c0_3 = arith.constant 0 : index
    %4 = vector.load %arg2[%c0_2, %c0_3] : memref<8x1xi32, #tpu.memory_space<vmem>>, vector<8x1xi32>
    %c0_4 = arith.constant 0 : index
    %c0_5 = arith.constant 0 : index
    %5 = vector.load %arg3[%c0_4, %c0_5] : memref<1x4xf32, #tpu.memory_space<vmem>>, vector<1x4xf32>
    %6 = tpu.iota {dimensions = array<i32: 1>} : vector<8x4xi32>
    %7 = vector.broadcast %4 : vector<8x1xi32> to vector<8x4xi32>
    %8 = arith.cmpi eq, %6, %7 : vector<8x4xi32>
    %9 = tpu.iota {dimensions = array<i32: 0>} : vector<8x1xi32>
    %c8_i32 = arith.constant 8 : i32
    %10 = arith.muli %arg0, %c8_i32 : i32
    %11 = vector.broadcast %10 : i32 to vector<8x1xi32>
    %12 = arith.addi %9, %11 : vector<8x1xi32>
    %c8_i32_6 = arith.constant 8 : i32
    %13 = vector.broadcast %c8_i32_6 : i32 to vector<8x1xi32>
    %14 = arith.cmpi slt, %12, %13 : vector<8x1xi32>
    %15 = arith.extui %14 : vector<8x1xi1> to vector<8x1xi32>
    %16 = arith.sitofp %15 : vector<8x1xi32> to vector<8x1xf32>
    %cst = arith.constant 0.000000e+00 : f32
    %17 = vector.broadcast %cst : f32 to vector<8x4xf32>
    %18 = arith.subf %17, %3 : vector<8x4xf32>
    %cst_7 = arith.constant 0.000000e+00 : f32
    %19 = vector.broadcast %cst_7 : f32 to vector<8x4xf32>
    %20 = arith.maximumf %18, %19 : vector<8x4xf32>
    %21 = math.absf %3 : vector<8x4xf32>
    %cst_8 = arith.constant 0.000000e+00 : f32
    %22 = vector.broadcast %cst_8 : f32 to vector<8x4xf32>
    %23 = arith.subf %22, %21 : vector<8x4xf32>
    %24 = math.exp %23 : vector<8x4xf32>
    %25 = math.log1p %24 : vector<8x4xf32>
    %26 = arith.addf %20, %25 : vector<8x4xf32>
    %cst_9 = arith.constant 0.000000e+00 : f32
    %27 = vector.broadcast %cst_9 : f32 to vector<8x4xf32>
    %28 = arith.select %8, %3, %27 : vector<8x4xi1>, vector<8x4xf32>
    %29 = arith.addf %26, %3 : vector<8x4xf32>
    %30 = arith.subf %29, %28 : vector<8x4xf32>
    %31 = arith.addf %28, %26 : vector<8x4xf32>
    %cst_10 = arith.constant -2.000000e+00 : f32
    %32 = vector.broadcast %cst_10 : f32 to vector<8x4xf32>
    %33 = arith.mulf %32, %31 : vector<8x4xf32>
    %34 = math.exp %33 : vector<8x4xf32>
    %35 = arith.mulf %34, %30 : vector<8x4xf32>
    %cst_11 = arith.constant dense<0.000000e+00> : vector<8xf32>
    %36 = vector.multi_reduction <add>, %35, %cst_11 [1] : vector<8x4xf32> to vector<8xf32>
    %37 = vector.shape_cast %36 : vector<8xf32> to vector<8x1xf32>
    %cst_12 = arith.constant 0.000000e+00 : f32
    %38 = vector.shape_cast %5 : vector<1x4xf32> to vector<1x4xf32>
    %39 = vector.broadcast %38 : vector<1x4xf32> to vector<8x4xf32>
    %40 = vector.broadcast %cst_12 : f32 to vector<8x4xf32>
    %41 = arith.select %8, %39, %40 : vector<8x4xi1>, vector<8x4xf32>
    %cst_13 = arith.constant dense<0.000000e+00> : vector<8xf32>
    %42 = vector.multi_reduction <add>, %41, %cst_13 [1] : vector<8x4xf32> to vector<8xf32>
    %43 = vector.shape_cast %42 : vector<8xf32> to vector<8x1xf32>
    %c0_14 = arith.constant 0 : index
    %c0_15 = arith.constant 0 : index
    %44 = vector.load %arg6[%c0_14, %c0_15] : memref<1x1xf32, #tpu.memory_space<vmem>>, vector<1x1xf32>
    %45 = arith.mulf %37, %43 : vector<8x1xf32>
    %46 = arith.mulf %45, %16 : vector<8x1xf32>
    %47 = vector.shape_cast %46 : vector<8x1xf32> to vector<1x8x1xf32>
    %cst_16 = arith.constant dense<0.000000e+00> : vector<1xf32>
    %48 = vector.multi_reduction <add>, %47, %cst_16 [1, 2] : vector<1x8x1xf32> to vector<1xf32>
    %49 = vector.shape_cast %48 : vector<1xf32> to vector<1x1x1xf32>
    %50 = vector.extract %49[0, 0, 0] : f32 from vector<1x1x1xf32>
    %51 = vector.broadcast %50 : f32 to vector<1x1xf32>
    %52 = arith.addf %44, %51 : vector<1x1xf32>
    %c0_17 = arith.constant 0 : index
    %c0_18 = arith.constant 0 : index
    %53 = vector.load %arg6[%c0_17, %c0_18] : memref<1x1xf32, #tpu.memory_space<vmem>>, vector<1x1xf32>
    tpu.vector_store %arg6[%c0_17, %c0_18], %52 {strides = array<i32>} : memref<1x1xf32, #tpu.memory_space<vmem>>, vector<1x1xf32>,
    %cst_19 = arith.constant dense<0xFF800000> : vector<8xf32>
    %54 = vector.multi_reduction <maximumf>, %3, %cst_19 [1] : vector<8x4xf32> to vector<8xf32>
    %55 = vector.shape_cast %54 : vector<8xf32> to vector<8x1xf32>
    %56 = vector.broadcast %55 : vector<8x1xf32> to vector<8x4xf32>
    %57 = arith.cmpf oeq, %3, %56 : vector<8x4xf32>
    %c4_i32 = arith.constant 4 : i32
    %58 = vector.broadcast %c4_i32 : i32 to vector<8x4xi32>
    %59 = arith.select %57, %6, %58 : vector<8x4xi1>, vector<8x4xi32>
    %cst_20 = arith.constant dense<2147483647> : vector<8xi32>
    %60 = vector.multi_reduction <minsi>, %59, %cst_20 [1] : vector<8x4xi32> to vector<8xi32>
    %61 = vector.shape_cast %60 : vector<8xi32> to vector<8x1xi32>
    %62 = arith.cmpi eq, %61, %4 : vector<8x1xi32>
    %63 = arith.extui %62 : vector<8x1xi1> to vector<8x1xi32>
    %64 = arith.sitofp %63 : vector<8x1xi32> to vector<8x1xf32>
    %65 = arith.mulf %64, %16 : vector<8x1xf32>
    %c0_21 = arith.constant 0 : index
    %c0_22 = arith.constant 0 : index
    %66 = vector.load %arg7[%c0_21, %c0_22] : memref<1x1xf32, #tpu.memory_space<vmem>>, vector<1x1xf32>
    %67 = vector.shape_cast %65 : vector<8x1xf32> to vector<1x8x1xf32>
    %cst_23 = arith.constant dense<0.000000e+00> : vector<1xf32>
    %68 = vector.multi_reduction <add>, %67, %cst_23 [1, 2] : vector<1x8x1xf32> to vector<1xf32>
    %69 = vector.shape_cast %68 : vector<1xf32> to vector<1x1x1xf32>
    %70 = vector.extract %69[0, 0, 0] : f32 from vector<1x1x1xf32>
    %71 = vector.broadcast %70 : f32 to vector<1x1xf32>
    %72 = arith.addf %66, %71 : vector<1x1xf32>
    %c0_24 = arith.constant 0 : index
    %c0_25 = arith.constant 0 : index
    %73 = vector.load %arg7[%c0_24, %c0_25] : memref<1x1xf32, #tpu.memory_space<vmem>>, vector<1x1xf32>
    tpu.vector_store %arg7[%c0_24, %c0_25], %72 {strides = array<i32>} : memref<1x1xf32, #tpu.memory_space<vmem>>, vector<1x1xf32>,
    %c0_i32_26 = arith.constant 0 : i32
    %74 = arith.cmpi eq, %arg0, %c0_i32_26 : i32
    %75 = arith.extui %74 : i1 to i32
    %c0_i32_27 = arith.constant 0 : i32
    %76 = arith.cmpi ne, %75, %c0_i32_27 : i32
    scf.if %76 {
      %c0_28 = arith.constant 0 : index
      %c0_29 = arith.constant 0 : index
      %77 = vector.load %arg6[%c0_28, %c0_29] : memref<1x1xf32, #tpu.memory_space<vmem>>, vector<1x1xf32>
      %cst_30 = arith.constant 1.250000e-01 : f32
      %78 = vector.broadcast %cst_30 : f32 to vector<1x1xf32>
      %79 = arith.mulf %77, %78 : vector<1x1xf32>
      %c0_31 = arith.constant 0 : index
      %c0_32 = arith.constant 0 : index
      %80 = vector.load %arg4[%c0_31, %c0_32] : memref<1x1xf32, #tpu.memory_space<vmem>>, vector<1x1xf32>
      tpu.vector_store %arg4[%c0_31, %c0_32], %79 {strides = array<i32>} : memref<1x1xf32, #tpu.memory_space<vmem>>, vector<1x1xf32>,
      %c0_33 = arith.constant 0 : index
      %c0_34 = arith.constant 0 : index
      %81 = vector.load %arg7[%c0_33, %c0_34] : memref<1x1xf32, #tpu.memory_space<vmem>>, vector<1x1xf32>
      %cst_35 = arith.constant 1.250000e-01 : f32
      %82 = vector.broadcast %cst_35 : f32 to vector<1x1xf32>
      %83 = arith.mulf %81, %82 : vector<1x1xf32>
      %c0_36 = arith.constant 0 : index
      %c0_37 = arith.constant 0 : index
      %84 = vector.load %arg5[%c0_36, %c0_37] : memref<1x1xf32, #tpu.memory_space<vmem>>, vector<1x1xf32>
      tpu.vector_store %arg5[%c0_36, %c0_37], %83 {strides = array<i32>} : memref<1x1xf32, #tpu.memory_space<vmem>>, vector<1x1xf32>,
    } else {
    }
    return
  }
  func.func @transform_0(%arg0: i32) -> (i32, i32) {
    %c0_i32 = arith.constant 0 : i32
    %c0_i32_0 = arith.constant 0 : i32
    return %arg0, %c0_i32 : i32, i32
  }
  func.func @transform_1(%arg0: i32) -> (i32, i32) {
    %c0_i32 = arith.constant 0 : i32
    %c0_i32_0 = arith.constant 0 : i32
    return %arg0, %c0_i32 : i32, i32
  }
  func.func @transform_2(%arg0: i32) -> (i32, i32) {
    %c0_i32 = arith.constant 0 : i32
    %c0_i32_0 = arith.constant 0 : i32
    %c0_i32_1 = arith.constant 0 : i32
    return %c0_i32, %c0_i32_0 : i32, i32
  }
  func.func @transform_3(%arg0: i32) -> (i32, i32) {
    %c0_i32 = arith.constant 0 : i32
    %c0_i32_0 = arith.constant 0 : i32
    %c0_i32_1 = arith.constant 0 : i32
    return %c0_i32, %c0_i32_0 : i32, i32
  }
  func.func @transform_4(%arg0: i32) -> (i32, i32) {
    %c0_i32 = arith.constant 0 : i32
    %c0_i32_0 = arith.constant 0 : i32
    %c0_i32_1 = arith.constant 0 : i32
    return %c0_i32, %c0_i32_0 : i32, i32
  }
}

</mosaic_0001>

<bundles_post_ra>
// kernel: tpu_custom_call.1
= control target key start
LH: loop header
LB: loop body
LE: loop exit
PB: predicated region body
PF: predicated region fallthrough
CT: control target
= control target key end

     0   :  { %10 = vsyncpa [#allocation5], 0  ;;  %vm66_vm0 = vcmask 31744   ;;  %s294_s0 = inlined_call_operand.vmem [shape: f32[8,4], index: 0, kind: input, shape index: {}]   ;;  %s295_s1 = inlined_call_operand.vmem [shape: s32[8,1], index: 1, kind: input, shape index: {}]   ;;  %s296_s2 = inlined_call_operand.vmem [shape: f32[1,4], index: 2, kind: input, shape index: {}]   ;;  %s297_s3 = inlined_call_operand.hbm [shape: f32[1,1], index: 3, kind: output, shape index: {0}]   ;;  %s298_s4 = inlined_call_operand.hbm [shape: f32[1,1], index: 4, kind: output, shape index: {1}]  }
   0x1   :  { %v25_v0 = vld [vmem:[%s294_s0] sm:$0xff] }
   0x2   :  { %11 = vsyncpa [#allocation7], 0  ;;  %v98_v1 = vsel %vm66_vm0, %v25_v0, -inf  ;;  %v234_v2 = vmov 0   ;;  %v270_v3 = vld [vmem:[%s295_s1] sm:$0xff]  ;;  %v28_v10 = vlaneseq  ;;  %v42_v15 = vsub.f32 0.0, %v25_v0 }
   0x3   :  { %183 = vset.pattern.permute.xlu0 %v234_v2  ;;  %v44_v4 = vand.u32 2147483647, %v25_v0  ;;  %v173_v39 = vld [vmem:[%s296_s2] ss:$0 sm:$0xff]  ;;  %vm22_vm5 = vcmask 0   ;;  %v235_v43 = vmov 0.0  }
   0x4   :  { %99 = vmax.xlane.f32.xlu0 %v98_v1  ;;  %v29_v14 = vand.u32 127, %v28_v10  ;;  %v43_v21 = vmax.f32 %v42_v15, 0.0  ;;  %23 = vst.msk [vmem:[#allocation2] sm:$0x1] %vm22_vm5, %v235_v43  ;;  %24 = vst.msk [vmem:[#allocation3] sm:$0x1] %vm22_vm5, %v235_v43 }
   0x5   :  { %v45_v5 = vsub.f32 0.0, %v44_v4  ;;  %vm83_vm6 = vcmask 7168   ;;  %s236_s20 = smov [#allocation4]   ;;  %s237_s22 = smov [#allocation6]  }
   0x6   :  { %s151_s21 = sshll.u32 %s236_s20, 4  ;;  %s161_s23 = sshll.u32 %s237_s22, 4  ;;  %s152_s21 = int_to_ptr.vmem [resolvable:$true] %s151_s21  ;;  %s162_s23 = int_to_ptr.vmem [resolvable:$true] %s161_s23 }
   0x7   :  { %v46_v6 = vmul.f32 1.442695, %v45_v5  ;;  %s190_s24 = scalar_lea.vmem %s152_s21, 16  ;;  %s194_s25 = scalar_lea.vmem %s152_s21, 32 }
   0x8   :  { %p191_p0 = scmp.ne.s32.totalorder %s152_s21, %s190_s24  ;;  %p195_p1 = scmp.lt.s32.totalorder %s152_s21, %s152_s21 }
   0x9   :  { %184 = vpow2.f32 %v46_v6  ;;  %p196_p2 = scmp.lt.s32.totalorder %s194_s25, %s190_s24 }
   0xb   :  { %v80_v5 = vld [vmem:[#allocation2] sm:$0x1]  ;;  %p197_p3 = por %p196_p2, %p195_p1 }
   0xd   :  { %p198_p4 = pnand %p197_p3, %p191_p0 }
  0x16   :  { %v185_v7 = vpop.eup %184 }
  0x17   :  { %v48_v8 = vadd.f32 1.0, %v185_v7  ;;  %v51_v9 = vmul.f32 -0.5, %v185_v7  ;;  %v54_v13 = vand.u32 2147483647, %v185_v7 }
  0x19   :  { %186 = vlog2.f32 %v48_v8  ;;  %v52_v11 = vadd.f32 1.0, %v51_v9  ;;  %vm55_vm2 = vcmp.lt.f32.partialorder %v54_v13, 0.0004427343  ;;  %v122_v8 = vld [vmem:[#allocation3] sm:$0x1] }
  0x1a   :  { %31 = vperm.xlu0 %183, %v270_v3  }
  0x1b   :  { %v53_v18 = vmul.f32 %v185_v7, %v52_v11 }
  0x26   :  { %v187_v12 = vpop.eup %186 }
  0x27   :  { %v50_v17 = vmul.f32 0.6931472, %v187_v12 }
  0x29   :  { %v56_v23 = vsel %vm55_vm2, %v53_v18, %v50_v17 }
  0x2a   :  { %v57_v25 = vadd.f32 %v56_v23, %v43_v21 }
  0x2c   :  { %v59_v31 = vadd.f32 %v57_v25, %v25_v0 }
  0x8d   :  { %v100_v16 = vpop.xlane.xlu0 %99 }
  0x8e   :  { %vm101_vm1 = vcmp.eq.f32.partialorder %v25_v0, %v100_v16 }
  0x8f   :  { %v102_v19 = vsel %vm101_vm1, %v29_v14, 4 }
  0x90   :  { %v103_v20 = vsel %vm66_vm0, %v102_v19, 2147483647 }
  0x91   :  { %v105_v22 = vshra.s32 %v103_v20, 16  ;;  %v104_v36 = vand.u32 65535, %v103_v20 }
  0x93   :  { %v107_v24 = vcvt.s32.f32 %v105_v22  ;;  %v106_v38 = vcvt.s32.f32 %v104_v36 }
  0x95   :  { %108 = vmin.xlane.f32.xlu1 %v107_v24  ;;  %v32_v26 = vpop.permute.xlu0 %31 }
  0x96   :  { %vm33_vm3 = vcmp.eq.s32.totalorder %v29_v14, %v32_v26 }
  0x97   :  { %v58_v27 = vsel %vm33_vm3, %v25_v0, 0.0  ;;  %v76_v41 = vsel %vm33_vm3, %v173_v39, 0.0 }
  0x98   :  { %v61_v28 = vadd.f32 %v58_v27, %v57_v25  ;;  %v60_v32 = vsub.f32 %v59_v31, %v58_v27  ;;  %v77_v42 = vsel %vm66_vm0, %v76_v41, 0.0 }
  0x9a   :  { %v62_v29 = vmul.f32 -2.0, %v61_v28 }
  0x9c   :  { %v63_v30 = vmul.f32 1.442695, %v62_v29 }
  0x9e   :  { %188 = vpow2.f32 %v63_v30 }
  0xab   :  { %v189_v33 = vpop.eup %188 }
  0xac   :  { %v65_v34 = vmul.f32 %v189_v33, %v60_v32 }
  0xae   :  { %v67_v35 = vsel %vm66_vm0, %v65_v34, 0.0 }
  0xaf   :  { %68 = vadd.xlane.f32.xlu1 %v67_v35 }
 0x11e   :  { %v109_v37 = vpop.xlane.xlu1 %108 }
 0x11f   :  { %vm110_vm4 = vcmp.eq.f32.partialorder %v107_v24, %v109_v37  ;;  %v115_v45 = vcvt.f32.s32 %v109_v37 }
 0x120   :  { %v111_v40 = vsel %vm110_vm4, %v106_v38, inf }
 0x121   :  { %112 = vmin.xlane.f32.xlu1 %v111_v40  ;;  %v116_v47 = vshll.u32 %v115_v45, 16 }
 0x125   :  { %78 = vadd.xlane.f32.xlu1 %v77_v42 }
 0x138   :  { %v69_v44 = vpop.xlane.xlu1 %68 }
 0x1aa   :  { %v113_v46 = vpop.xlane.xlu1 %112 }
 0x1ab   :  { %v114_v48 = vcvt.f32.s32 %v113_v46 }
 0x1ad   :  { %v117_v49 = vadd.s32 %v116_v47, %v114_v48 }
 0x1ae   :  { %v79_v50 = vpop.xlane.xlu1 %78 }
 0x1af   :  { %v81_v51 = vmul.f32 %v79_v50, %v69_v44  ;;  %vm118_vm7 = vcmp.eq.s32.totalorder %v117_v49, %v270_v3 }
 0x1b0   :  { %v174_v53 = vsel %vm118_vm7, 1.0, %v235_v43 }
 0x1b1   :  { %v84_v52 = vsel %vm83_vm6, %v81_v51, 0.0  ;;  %v123_v54 = vsel %vm83_vm6, %v174_v53, 0.0 }
 0x1b2   :  { %85 = vadd.xlane.f32.xlu1 %v84_v52 }
 0x1b6   :  { %124 = vadd.xlane.f32.xlu1 %v123_v54 }
 0x23b   :  { %v86_v55 = vpop.xlane.xlu1 %85 }
 0x23c   :  { %v87_v56 = vrot.slane %v86_v55, 4 }
 0x23e   :  { %v88_v57 = vadd.f32 %v87_v56, %v86_v55 }
 0x23f   :  { %v125_v58 = vpop.xlane.xlu1 %124 }
 0x240   :  { %v89_v59 = vrot.slane %v88_v57, 2  ;;  %v126_v60 = vrot.slane %v125_v58, 4 }
 0x242   :  { %v127_v61 = vadd.f32 %v126_v60, %v125_v58  ;;  %v90_v62 = vadd.f32 %v89_v59, %v88_v57 }
 0x244   :  { %v128_v63 = vrot.slane %v127_v61, 2  ;;  %v91_v0 = vrot.slane %v90_v62, 1 }
 0x246   :  { %v129_v1 = vadd.f32 %v128_v63, %v127_v61  ;;  %v92_v2 = vadd.f32 %v91_v0, %v90_v62 }
 0x248   :  { %175 = vpush %v92_v2  ;;  %v130_v4 = vrot.slane %v129_v1, 1 }
 0x24a   :  { %v131_v3 = vadd.f32 %v130_v4, %v129_v1 }
 0x24c   :  { %177 = vpush %v131_v3 }
 0x279   :  { %s176_s2 = spop %175 }
 0x27a   :  { %v94_v6 = vstv %s176_s2 }
 0x27b   :  { %v95_v7 = vadd.f32 %v94_v6, %v80_v5 }
 0x27d   :  { %97 = vst.msk [vmem:[#allocation2] sm:$0x1] %vm22_vm5, %v95_v7  ;;  %s178_s19 = spop %177 }
 0x27e   :  { %v133_v9 = vstv %s178_s19 }
 0x27f   :  { %v134_v10 = vadd.f32 %v133_v9, %v122_v8 }
 0x281   :  { %135 = vst.msk [vmem:[#allocation3] sm:$0x1] %vm22_vm5, %v134_v10 }
 0x284   :  { %v139_v11 = vld [vmem:[#allocation2] sm:$0x1] }
 0x285   :  { %v140_v12 = vmul.f32 0.125, %v139_v11 }
 0x287   :  { %141 = vst.msk [vmem:[#allocation4] sm:$0x1] %vm22_vm5, %v140_v12 }
 0x288   :  { %201 = shalt.err (!%p198_p4)
}
 0x289   :  { %154 = dma.vmem_to_hbm [thread:$0]  %s152_s21, 16, %s297_s3, [#allocation5]   ;;  %v142_v13 = vld [vmem:[#allocation3] sm:$0x1] }
 0x28a   :  { %v143_v14 = vmul.f32 0.125, %v142_v13  ;;  %s210_s28 = scalar_lea.vmem %s162_s23, 16  ;;  %s214_s29 = scalar_lea.vmem %s162_s23, 32 }
 0x28b   :  { %p211_p5 = scmp.ne.s32.totalorder %s162_s23, %s210_s28  ;;  %p215_p6 = scmp.lt.s32.totalorder %s162_s23, %s162_s23 }
 0x28c   :  { %144 = vst.msk [vmem:[#allocation6] sm:$0x1] %vm22_vm5, %v143_v14  ;;  %p216_p7 = scmp.lt.s32.totalorder %s214_s29, %s210_s28 }
 0x28e   :  { %p217_p8 = por %p216_p7, %p215_p6 }
 0x290   :  { %p218_p9 = pnand %p217_p8, %p211_p5 }
 0x292   :  { %221 = shalt.err (!%p218_p9)
}
 0x293   :  { %164 = dma.vmem_to_hbm [thread:$0]  %s162_s23, 16, %s298_s4, [#allocation7]  }
 0x294   :  { %230 = dma.done.wait [#allocation5], 16  }
 0x295   :  { %231 = vsyncadd [#allocation5], 4294967280 }
 0x296   :  { %232 = dma.done.wait [#allocation7], 16  }
 0x297   :  { %233 = vsyncadd [#allocation7], 4294967280 }
 0x298   :  { %171 = vsyncpa [#allocation5], 1 }
 0x299   :  { %172 = vsyncpa [#allocation7], 1 }

</bundles_post_ra>
